<compile_context>
chip_gen: v5e
topology: v5e:2x2
jax: 0.10.0
libtpu: 0.0.40
codegen_flags: <defaults>
</compile_context>

<pallas_src>
import functools

import jax
import jax.numpy as jnp
import numpy as np
from jax.experimental import pallas as pl
from jax.experimental.pallas import tpu as pltpu


# ----------------------------------------------------------------------------
# helpers
# ----------------------------------------------------------------------------
def _largest_divisor_leq(n, cap):
    cap = int(max(1, min(n, cap)))
    for d in range(cap, 0, -1):
        if n % d == 0:
            return d
    return 1


def _pick_m_tile(m, target=1024):
    """Lane-dense spatial tile: full axis if small, else a 128-multiple divisor."""
    if m <= target:
        return m
    t = (target // 128) * 128
    while t >= 128:
        if m % t == 0:
            return t
        t -= 128
    return m  # fall back to the whole (full-dim) axis


# ----------------------------------------------------------------------------
# 1x1x1 conv path: fused BN+ReLU -> channel-mixing matmul (+ optional residual)
#   scale/shift : (Cin, 1)      w : (Cout, Cin)
#   x_ref       : (Cin, TM)     o : (Cout, TM)   (TM = lane-dense spatial tile)
# ----------------------------------------------------------------------------
def _pointwise_kernel(scale_ref, shift_ref, x_ref, w_ref, *rest, has_res):
    if has_res:
        res_ref, o_ref = rest
    else:
        (o_ref,) = rest
    h = jnp.maximum(x_ref[...] * scale_ref[...] + shift_ref[...], 0.0)
    out = jnp.dot(w_ref[...], h, preferred_element_type=jnp.float32)
    if has_res:
        out = out + res_ref[...]
    o_ref[...] = out.astype(o_ref.dtype)


def _pointwise_bn_conv(x, p, *, stride, residual):
    sT, sH, sW = stride
    if (sT, sH, sW) != (1, 1, 1):
        # 1x1x1 conv: BN/ReLU is per-channel elementwise, so it commutes with
        # spatial subsampling -> decimate first (cuts bytes and FLOPs by s^3).
        x = x[:, :, ::sT, ::sH, ::sW]
    N, Cin, Do, Ho, Wo = x.shape
    M = Do * Ho * Wo
    Cout = p["weight"].shape[0]

    scale1 = p["gamma"] / jnp.sqrt(p["var"] + p["eps"])
    shift1 = p["beta"] - p["mean"] * scale1
    scale = scale1.reshape(Cin, 1)
    shift = shift1.reshape(Cin, 1)
    w = p["weight"].reshape(Cout, Cin)
    xf = x.reshape(N, Cin, M)

    TM = _pick_m_tile(M)
    has_res = residual is not None

    args = [scale, shift, xf, w]
    in_specs = [
        pl.BlockSpec((Cin, 1), lambda n, mi: (0, 0)),
        pl.BlockSpec((Cin, 1), lambda n, mi: (0, 0)),
        pl.BlockSpec((None, Cin, TM), lambda n, mi: (n, 0, mi)),
        pl.BlockSpec((Cout, Cin), lambda n, mi: (0, 0)),
    ]
    if has_res:
        args.append(residual.reshape(N, Cout, M))
        in_specs.append(pl.BlockSpec((None, Cout, TM), lambda n, mi: (n, 0, mi)))

    out = pl.pallas_call(
        functools.partial(_pointwise_kernel, has_res=has_res),
        out_shape=jax.ShapeDtypeStruct((N, Cout, M), jnp.float32),
        grid_spec=pltpu.PrefetchScalarGridSpec(
            num_scalar_prefetch=0,
            grid=(N, M // TM),
            in_specs=in_specs,
            out_specs=pl.BlockSpec((None, Cout, TM), lambda n, mi: (n, 0, mi)),
        ),
        compiler_params=pltpu.CompilerParams(
            dimension_semantics=("parallel", "parallel")),
    )(*args)
    return out.reshape(N, Cout, Do, Ho, Wo)


# ----------------------------------------------------------------------------
# Spatial (kT,kH,kW) grouped conv path: fused BN+ReLU + zero-pad + folded-tap
# im2col matmul (+ optional residual).  One grid step = one (group, batch).
#   scale/shift : (Cin,) in SMEM      x_ref : (Cg, D, H, W) raw NCDHW slice
#   w_ref       : (Cog, kT*kH*kW*Cg)  o_ref : (Cog, Do*Ho*Wo) lane-dense
#   hbuf        : (Cg, Dp, Hp, Wp)    padded BN+ReLU activation (VMEM)
#   slab        : (kT*kH*kW*Cg, Dc*Ho*Wo) im2col slab (VMEM)
# ----------------------------------------------------------------------------
def _spatial_kernel(scale_ref, shift_ref, x_ref, w_ref, *rest,
                    kT, kH, kW, sT, sH, sW, pT, pH, pW,
                    Do, Ho, Wo, Dc, Cg, has_res):
    if has_res:
        res_ref, o_ref, hbuf_ref, slab_ref = rest
    else:
        o_ref, hbuf_ref, slab_ref = rest

    _, D, H, W = x_ref.shape
    HW = Ho * Wo
    Mc = Dc * HW
    g = pl.program_id(0)
    cbase = g * Cg

    # --- fused BN(inference) + ReLU into a zero-padded VMEM buffer ----------
    # Border must stay exactly 0 (relu(bn(0)) is generally nonzero), so BN is
    # applied only to the interior of the freshly-zeroed buffer.
    hbuf_ref[...] = jnp.zeros_like(hbuf_ref)
    for c in range(Cg):
        s = scale_ref[cbase + c]
        b = shift_ref[cbase + c]
        hbuf_ref[c, pT:pT + D, pH:pH + H, pW:pW + W] = jnp.maximum(
            x_ref[c] * s + b, 0.0)

    # --- im2col slab (taps folded into the contraction dim) + one dot -------
    dlen = Dc * sT if sT > 1 else Dc
    hlen = Ho * sH if sH > 1 else Ho
    wlen = Wo * sW if sW > 1 else Wo
    for ci in range(Do // Dc):
        d0 = ci * Dc
        tap = 0
        for dt in range(kT):
            for dh in range(kH):
                for dw in range(kW):
                    dstart = dt + d0 * sT
                    win = hbuf_ref[:, dstart:dstart + dlen,
                                   dh:dh + hlen, dw:dw + wlen]
                    if sT > 1:
                        win = win.reshape(Cg, Dc, sT, hlen, wlen)[:, :, 0]
                    if sH > 1:
                        win = win.reshape(Cg, Dc, Ho, sH, wlen)[:, :, :, 0]
                    if sW > 1:
                        win = win.reshape(Cg, Dc, Ho, Wo, sW)[..., 0]
                    slab_ref[tap * Cg:(tap + 1) * Cg, :] = win.reshape(Cg, Mc)
                    tap += 1
        out = jnp.dot(w_ref[...], slab_ref[...],
                      preferred_element_type=jnp.float32)
        if has_res:
            out = out + res_ref[:, d0 * HW:(d0 + Dc) * HW]
        o_ref[:, d0 * HW:(d0 + Dc) * HW] = out.astype(o_ref.dtype)


def _spatial_bn_conv(x, p, *, kernel, pad, stride, groups, residual):
    N, Cin, D, H, W = x.shape
    kT, kH, kW = kernel
    pT, pH, pW = pad
    sT, sH, sW = stride
    Cout = p["weight"].shape[0]
    assert Cin % groups == 0 and Cout % groups == 0
    Cg, Cog = Cin // groups, Cout // groups

    Do = (D + 2 * pT - kT) // sT + 1
    Ho = (H + 2 * pH - kH) // sH + 1
    Wo = (W + 2 * pW - kW) // sW + 1
    # padded-buffer extents (extra right pad only when a stride needs it)
    Dp = D + 2 * pT if sT == 1 else max(D + 2 * pT, kT - 1 + Do * sT)
    Hp = H + 2 * pH if sH == 1 else max(H + 2 * pH, kH - 1 + Ho * sH)
    Wp = W + 2 * pW if sW == 1 else max(W + 2 * pW, kW - 1 + Wo * sW)
    T = kT * kH * kW
    HW = Ho * Wo
    M = Do * HW

    # inference-form BN folded into per-channel scale / shift (SMEM scalars)
    scale = p["gamma"] / jnp.sqrt(p["var"] + p["eps"])
    shift = p["beta"] - p["mean"] * scale

    # (Cout, Cg, kT, kH, kW) -> (G, Cog, kT*kH*kW*Cg); contraction dim is
    # tap-major / in-channel-minor, matching the im2col slab row order.
    w = p["weight"].reshape(groups, Cog, Cg, kT, kH, kW)
    w = w.transpose(0, 1, 3, 4, 5, 2).reshape(groups, Cog, T * Cg)

    # output-depth chunk bounds the im2col slab held in VMEM
    slab_budget = 2 * 1024 * 1024
    Dc = _largest_divisor_leq(Do, max(1, slab_budget // (T * Cg * HW * 4)))

    # TODO(synk): for very large Cg*D*H*W the whole per-(group,batch) plane is
    #             held in VMEM; a channel / spatial tile axis (and a raised
    #             vmem_limit_bytes) would be needed at that scale.
    has_res = residual is not None
    kern = functools.partial(
        _spatial_kernel, kT=kT, kH=kH, kW=kW, sT=sT, sH=sH, sW=sW,
        pT=pT, pH=pH, pW=pW, Do=Do, Ho=Ho, Wo=Wo, Dc=Dc, Cg=Cg,
        has_res=has_res)

    args = [scale, shift, x, w]
    in_specs = [
        pl.BlockSpec(memory_space=pltpu.MemorySpace.SMEM),   # scale (Cin,)
        pl.BlockSpec(memory_space=pltpu.MemorySpace.SMEM),   # shift (Cin,)
        # one (group, batch) slice of raw NCDHW x -> contiguous DMA
        pl.BlockSpec((None, Cg, D, H, W), lambda g, n: (n, g, 0, 0, 0)),
        # per-group weight; index depends only on g (outermost axis) so it is
        # fetched once per group and re-used while n varies.
        pl.BlockSpec((None, Cog, T * Cg), lambda g, n: (g, 0, 0)),
    ]
    if has_res:
        args.append(residual.reshape(N, Cout, M))
        in_specs.append(pl.BlockSpec((None, Cog, M), lambda g, n: (n, g, 0)))

    out = pl.pallas_call(
        kern,
        out_shape=jax.ShapeDtypeStruct((N, Cout, M), jnp.float32),
        grid_spec=pltpu.PrefetchScalarGridSpec(
            num_scalar_prefetch=0,
            grid=(groups, N),
            in_specs=in_specs,
            out_specs=pl.BlockSpec((None, Cog, M), lambda g, n: (n, g, 0)),
            scratch_shapes=[
                pltpu.VMEM((Cg, Dp, Hp, Wp), jnp.float32),    # padded BN+ReLU
                pltpu.VMEM((T * Cg, Dc * HW), jnp.float32),   # im2col slab
            ],
        ),
        compiler_params=pltpu.CompilerParams(
            dimension_semantics=("parallel", "parallel")),
    )(*args)
    return out.reshape(N, Cout, Do, Ho, Wo)


# ----------------------------------------------------------------------------
# BN_AC_CONV3D (eval-mode BN -> ReLU -> Conv3d, bias=False), NCDHW in/out.
# ----------------------------------------------------------------------------
def bn_ac_conv3d(x, p, *, kernel, pad, stride, groups, residual=None):
    # TODO(synk): BatchNorm3d is implemented in inference (running-stats) form;
    #             training-mode batch statistics / stat updates are not done.
    if kernel == (1, 1, 1) and groups == 1 and pad == (0, 0, 0):
        return _pointwise_bn_conv(x, p, stride=stride, residual=residual)
    return _spatial_bn_conv(x, p, kernel=kernel, pad=pad, stride=stride,
                            groups=groups, residual=residual)


# ----------------------------------------------------------------------------
# Pure-JAX reference for BN_AC_CONV3D (+ optional fused residual add).
# ----------------------------------------------------------------------------
def bn_ac_conv3d_ref(x, p, *, kernel, pad, stride, groups, residual=None):
    bshape = (1, -1, 1, 1, 1)
    xn = (x - p["mean"].reshape(bshape)) / jnp.sqrt(
        p["var"].reshape(bshape) + p["eps"])
    h = jnp.maximum(xn * p["gamma"].reshape(bshape) + p["beta"].reshape(bshape),
                    0.0)
    y = jax.lax.conv_general_dilated(
        h, p["weight"], window_strides=stride,
        padding=[(q, q) for q in pad],
        dimension_numbers=("NCDHW", "OIDHW", "NCDHW"),
        feature_group_count=groups,
        precision=jax.lax.Precision.HIGHEST)
    return y if residual is None else y + residual


# ----------------------------------------------------------------------------
# MF_UNIT forward (same composition for the Pallas path and the reference).
# Residual adds are pushed into the producing conv (fused in the kernels).
# ----------------------------------------------------------------------------
def mf_unit(x, params, *, g, stride, first_block, use_3d, conv_fn):
    kt3, pt3 = (3, 1) if use_3d else (1, 0)
    h = conv_fn(x, params["conv_i1"], kernel=(1, 1, 1), pad=(0, 0, 0),
                stride=(1, 1, 1), groups=1)
    x_in = conv_fn(h, params["conv_i2"], kernel=(1, 1, 1), pad=(0, 0, 0),
                   stride=(1, 1, 1), groups=1, residual=x)
    h = conv_fn(x_in, params["conv_m1"], kernel=(kt3, 3, 3), pad=(pt3, 1, 1),
                stride=stride, groups=g)
    if first_block:
        h = conv_fn(h, params["conv_m2"], kernel=(1, 1, 1), pad=(0, 0, 0),
                    stride=(1, 1, 1), groups=1)
        return conv_fn(x, params["conv_w1"], kernel=(1, 1, 1), pad=(0, 0, 0),
                       stride=stride, groups=1, residual=h)
    return conv_fn(h, params["conv_m2"], kernel=(1, 3, 3), pad=(0, 1, 1),
                   stride=(1, 1, 1), groups=g, residual=x)


# ----------------------------------------------------------------------------
# Deterministic parameter construction.
# ----------------------------------------------------------------------------
def make_bnconv_params(key, cin, cout, kernel, groups=1):
    kg, kb, km, kv, kw = jax.random.split(key, 5)
    fan_in = (cin // groups) * int(np.prod(kernel))
    return {
        "gamma": jax.random.uniform(kg, (cin,), jnp.float32, 0.5, 1.5),
        "beta": jax.random.normal(kb, (cin,), jnp.float32) * 0.1,
        "mean": jax.random.normal(km, (cin,), jnp.float32) * 0.1,
        "var": jax.random.uniform(kv, (cin,), jnp.float32, 0.5, 1.5),
        "eps": 1e-5,
        "weight": jax.random.normal(
            kw, (cout, cin // groups) + tuple(kernel), jnp.float32)
        * (1.0 / np.sqrt(fan_in)),
    }


def make_mf_unit_params(key, num_in, num_mid, num_out, g, first_block, use_3d):
    num_ix = num_mid // 4
    kt3, _ = (3, 1) if use_3d else (1, 0)
    keys = jax.random.split(key, 5)
    params = {
        "conv_i1": make_bnconv_params(keys[0], num_in, num_ix, (1, 1, 1), 1),
        "conv_i2": make_bnconv_params(keys[1], num_ix, num_in, (1, 1, 1), 1),
        "conv_m1": make_bnconv_params(keys[2], num_in, num_mid, (kt3, 3, 3), g),
    }
    if first_block:
        params["conv_m2"] = make_bnconv_params(keys[3], num_mid, num_out, (1, 1, 1), 1)
        params["conv_w1"] = make_bnconv_params(keys[4], num_in, num_out, (1, 1, 1), 1)
    else:
        params["conv_m2"] = make_bnconv_params(keys[3], num_mid, num_out, (1, 3, 3), g)
    return params


if __name__ == "__main__":
    key = jax.random.PRNGKey(0)
    kx, kp1, kp2 = jax.random.split(key, 3)
    x = jax.random.normal(kx, (2, 16, 4, 8, 8), dtype=jnp.float32)

    configs = [
        # Regular block: residual without projection, stride 1, grouped convs.
        dict(num_in=16, num_mid=16, num_out=16, g=2, stride=(1, 1, 1),
             first_block=False, use_3d=True),
        # First block: spatially strided, with conv_w1 projection shortcut.
        dict(num_in=16, num_mid=16, num_out=32, g=2, stride=(1, 2, 2),
             first_block=True, use_3d=True),
    ]

    for cfg, kp in zip(configs, (kp1, kp2)):
        params = make_mf_unit_params(kp, cfg["num_in"], cfg["num_mid"],
                                     cfg["num_out"], cfg["g"],
                                     cfg["first_block"], cfg["use_3d"])
        run = functools.partial(mf_unit, g=cfg["g"], stride=cfg["stride"],
                                first_block=cfg["first_block"],
                                use_3d=cfg["use_3d"])
        out = jax.block_until_ready(run(x, params, conv_fn=bn_ac_conv3d))
        ref = jax.block_until_ready(run(x, params, conv_fn=bn_ac_conv3d_ref))
        assert out.shape == ref.shape, (out.shape, ref.shape)
        np.testing.assert_allclose(np.asarray(out), np.asarray(ref),
                                   rtol=5e-4, atol=5e-4)

    print("KERNEL_OK")
</pallas_src>

<mosaic_0001>
module attributes {stable_mosaic.version = 11 : i64} {
  func.func @_pointwise_kernel(%arg0: i32, %arg1: i32, %arg2: memref<16x1xf32, #tpu.memory_space<vmem>>, %arg3: memref<16x1xf32, #tpu.memory_space<vmem>>, %arg4: memref<1x16x256xf32, #tpu.memory_space<vmem>>, %arg5: memref<4x16xf32, #tpu.memory_space<vmem>>, %arg6: memref<1x4x256xf32, #tpu.memory_space<vmem>>) attributes {dimension_semantics = [#tpu.dimension_semantics<parallel>, #tpu.dimension_semantics<parallel>], iteration_bounds = array<i64: 2, 1>, scalar_prefetch = 0 : i64, scratch_operands = 0 : i64, tpu.core_type = #tpu.core_type<tc>, window_params = [{pipeline_mode = #tpu.pipeline_mode<synchronous>, transform_indices = @transform_0, window_bounds = array<i64: 16, 1>}, {pipeline_mode = #tpu.pipeline_mode<synchronous>, transform_indices = @transform_1, window_bounds = array<i64: 16, 1>}, {transform_indices = @transform_2, window_bounds = array<i64: 1, 16, 256>}, {pipeline_mode = #tpu.pipeline_mode<synchronous>, transform_indices = @transform_3, window_bounds = array<i64: 4, 16>}, {transform_indices = @transform_4, window_bounds = array<i64: 1, 4, 256>}]} {
    %c0 = arith.constant 0 : index
    %c0_0 = arith.constant 0 : index
    %c0_1 = arith.constant 0 : index
    %0 = vector.load %arg4[%c0, %c0_0, %c0_1] : memref<1x16x256xf32, #tpu.memory_space<vmem>>, vector<1x16x256xf32>
    %1 = vector.shape_cast %0 : vector<1x16x256xf32> to vector<16x256xf32>
    %c0_2 = arith.constant 0 : index
    %c0_3 = arith.constant 0 : index
    %2 = vector.load %arg2[%c0_2, %c0_3] : memref<16x1xf32, #tpu.memory_space<vmem>>, vector<16x1xf32>
    %3 = vector.broadcast %2 : vector<16x1xf32> to vector<16x256xf32>
    %4 = arith.mulf %1, %3 : vector<16x256xf32>
    %c0_4 = arith.constant 0 : index
    %c0_5 = arith.constant 0 : index
    %5 = vector.load %arg3[%c0_4, %c0_5] : memref<16x1xf32, #tpu.memory_space<vmem>>, vector<16x1xf32>
    %6 = vector.broadcast %5 : vector<16x1xf32> to vector<16x256xf32>
    %7 = arith.addf %4, %6 : vector<16x256xf32>
    %cst = arith.constant 0.000000e+00 : f32
    %8 = vector.broadcast %cst : f32 to vector<16x256xf32>
    %9 = arith.maximumf %7, %8 : vector<16x256xf32>
    %c0_6 = arith.constant 0 : index
    %c0_7 = arith.constant 0 : index
    %10 = vector.load %arg5[%c0_6, %c0_7] : memref<4x16xf32, #tpu.memory_space<vmem>>, vector<4x16xf32>
    %cst_8 = arith.constant dense<0.000000e+00> : vector<4x256xf32>
    %11 = tpu.matmul %10, %9, %cst_8 {dimension_numbers = #tpu.dot_dimension_numbers<[1], [0], [0], [1], [0, 0, 1, 1], [], []>} : vector<4x16xf32>, vector<16x256xf32>, vector<4x256xf32> -> vector<4x256xf32>
    %c0_9 = arith.constant 0 : index
    %c0_10 = arith.constant 0 : index
    %c0_11 = arith.constant 0 : index
    %12 = vector.load %arg6[%c0_9, %c0_10, %c0_11] : memref<1x4x256xf32, #tpu.memory_space<vmem>>, vector<1x4x256xf32>
    %13 = vector.shape_cast %12 : vector<1x4x256xf32> to vector<4x256xf32>
    %14 = vector.shape_cast %11 : vector<4x256xf32> to vector<1x4x256xf32>
    tpu.vector_store %arg6[%c0_9, %c0_10, %c0_11], %14 {strides = array<i32>} : memref<1x4x256xf32, #tpu.memory_space<vmem>>, vector<1x4x256xf32>,
    return
  }
  func.func @transform_0(%arg0: i32, %arg1: i32) -> (i32, i32) {
    %c0_i32 = arith.constant 0 : i32
    %c0_i32_0 = arith.constant 0 : i32
    %c0_i32_1 = arith.constant 0 : i32
    return %c0_i32, %c0_i32_0 : i32, i32
  }
  func.func @transform_1(%arg0: i32, %arg1: i32) -> (i32, i32) {
    %c0_i32 = arith.constant 0 : i32
    %c0_i32_0 = arith.constant 0 : i32
    %c0_i32_1 = arith.constant 0 : i32
    return %c0_i32, %c0_i32_0 : i32, i32
  }
  func.func @transform_2(%arg0: i32, %arg1: i32) -> (i32, i32, i32) {
    %c0_i32 = arith.constant 0 : i32
    %c0_i32_0 = arith.constant 0 : i32
    return %arg0, %c0_i32, %arg1 : i32, i32, i32
  }
  func.func @transform_3(%arg0: i32, %arg1: i32) -> (i32, i32) {
    %c0_i32 = arith.constant 0 : i32
    %c0_i32_0 = arith.constant 0 : i32
    %c0_i32_1 = arith.constant 0 : i32
    return %c0_i32, %c0_i32_0 : i32, i32
  }
  func.func @transform_4(%arg0: i32, %arg1: i32) -> (i32, i32, i32) {
    %c0_i32 = arith.constant 0 : i32
    %c0_i32_0 = arith.constant 0 : i32
    return %arg0, %c0_i32, %arg1 : i32, i32, i32
  }
}

</mosaic_0001>

<bundles_post_ra>
// kernel: tpu_custom_call.1
= control target key start
LH: loop header
LB: loop body
LE: loop exit
PB: predicated region body
PF: predicated region fallthrough
CT: control target
= control target key end

     0   :  { %9 = vsyncpa [#allocation3], 0  ;;  %s797_s0 = inlined_call_operand.vmem [shape: f32[16,1], index: 0, kind: input, shape index: {}]   ;;  %s798_s1 = inlined_call_operand.vmem [shape: f32[16,1], index: 1, kind: input, shape index: {}]   ;;  %s799_s2 = inlined_call_operand.hbm [shape: f32[2,16,256], index: 2, kind: input, shape index: {}]   ;;  %s800_s3 = inlined_call_operand.vmem [shape: f32[4,16], index: 3, kind: input, shape index: {}]   ;;  %s801_s4 = inlined_call_operand.hbm [shape: f32[2,4,256], index: 4, kind: output, shape index: {}]  }
   0x1   :  { %11 = vsyncpa [#allocation3 + $0x1], 0 }
   0x2   :  { %12 = vsyncpa [#allocation4], 0 }
   0x3   :  { %14 = vsyncpa [#allocation4 + $0x1], 0  ;;  %s661_s15 = smov 0   ;;  %s663_s16 = smov 0  }
   0x4   :  { %s665_s17 = smov 0   ;;  %s667_s18 = smov 0  }
   0x5   :  { %s669_s19 = smov 0   ;;  %s671_s20 = smov 0  }
   0x6 LB: > { %s433_s21 = sadd.s32 4294967295, %s631_s20   ;;  %s434_s22 = sadd.s32 4294967294, %s631_s20   ;;  %s631_s20 = sphi %s671_s20, %s20_s20   ;;  %s627_s19 = sphi %s669_s19, %s810_s19   ;;  %s623_s18 = sphi %s667_s18, %s809_s18   ;;  %s619_s17 = sphi %s665_s17, %s808_s17   ;;  %s615_s16 = sphi %s663_s16, %s807_s16   ;;  %s611_s15 = sphi %s661_s15, %s806_s15  }
   0x7   : > { %s32_s23 = sadd.s32 1, %s627_s19  ;;  %s83_s24 = sadd.s32 1, %s619_s17 }
   0x8   : > { %p34_p0 = scmp.ge.s32.totalorder %s32_s23, 2  ;;  %p90_p1 = scmp.ne.s32.totalorder %s619_s17, %s615_s16 }
   0x9   : > { %p91_p2 = scmp.eq.s32.totalorder %s631_s20, 0  ;;  %p96_p3 = scmp.ne.s32.totalorder %s615_s16, %s611_s15 }
   0xa   : > { %s812_s23 = smov (%p34_p0, %s32_s23), 0  ;;  %p97_p5 = scmp.eq.s32.totalorder %s433_s21, 0 }
   0xb   : > { %p702_p4 = por %p91_p2, %p90_p1  ;;  %s78_s26 = ssub.s32 %s627_s19, %s812_s23 }
   0xc   : > { %p143_p6 = scmp.eq.s32.totalorder %s433_s21, 1  ;;  %p81_p7 = scmp.eq.s32.totalorder %s78_s26, 0 }
   0xd   : > { %p708_p8 = por %p97_p5, %p96_p3  ;;  %p149_p10 = scmp.eq.s32.totalorder %s434_s22, 1 }
   0xe   : > { %p712_p9 = por %p143_p6, %p90_p1  ;;  %p436_p12 = scmp.ge.s32.totalorder %s631_s20, 2 }
   0xf   : > { %s717_s29 = scalar_select %p81_p7, %s619_s17, %s83_s24  }
  0x10   : > { %p719_p11 = por %p149_p10, %p96_p3  ;;  %p464_p13 = scmp.lt.s32.totalorder %s631_s20, 2 }
  0x11   : > { %s178_s5 = sand.u32 1, %s619_s17   ;;  %s450_s7 = sshll.u32 %s627_s19, 5 }
  0x12   : > { %s437_s6 = sshll.u32 %s178_s5, 5  ;;  %s189_s10 = scalar_lea.hbm %s799_s2, %s450_s7 }
  0x13   : > { %s182_s11 = scalar_lea.vmem [#allocation2], %s437_s6  ;;  %s190_s13 = sshll.u32 %s189_s10, 4  ;;  %s191_s13 = int_to_ptr.hbm [resolvable:$true] %s190_s13 }
  0x14   : > { %s192_s12 = sshll.u32 %s182_s11, 4  ;;  %p457_p0 = pnand %p464_p13, %p702_p4  ;;  %s193_s12 = int_to_ptr.vmem [resolvable:$true] %s192_s12 }
  0x15   : > { %p440_p1 = scmp.ge.s32.totalorder %s631_s20, 1  ;;  %s179_s14 = scalar_lea.sflag [#allocation3], %s178_s5 }
  0x16   : > { %s633_s21 = smov 256   ;;  %s634_s22 = smov 16  }
  0x17   : > { %459 = dma.hbm_to_vmem [thread:$0]  (!%p457_p0), %s191_s13, 512, %s193_s12, %s179_s14, %s633_s21, %s633_s21, %s634_s22  }
  0x18   : > { %p200_p2 = scmp.lt.s32.totalorder %s631_s20, 3 }
  0x1a   : > { %p201_p3 = pnand %p440_p1, %p200_p2 }
  0x1b   : > { %s735_s24 = sand.u32 (!%p201_p3), 1, %s615_s16  }
  0x1c   : > { %204 = sbr.rel (%p201_p3) target bundleno = 298 (0x12a), region = 36  ;;  %s441_s26 = sshll.u32 (!%p201_p3), %s735_s24, 5 }
  0x1d   : > { %s207_s6 = scalar_lea.sflag (!%p201_p3), [#allocation3], %s735_s24  ;;  %s210_s7 = scalar_lea.vmem (!%p201_p3), [#allocation2], %s441_s26 }
  0x21   : > { %602 = dma.done.wait (%p708_p8), %s207_s6, 512  }
  0x22   : > { %604 = vsyncadd (%p708_p8), %s207_s6, 4294966784  ;;  %v635_v0 = vmov 0   ;;  %v259_v1 = vld [vmem:[%s798_s1 + $0x8] sm:$0xff]  ;;  %v258_v3 = vld [vmem:[%s798_s1] sm:$0xff]  ;;  %vm279_vm0 = vcmask 130048   ;;  %s442_s21 = sshll.u32 %s735_s24, 3 }
  0x23   : > { %518 = vset.pattern.permute.xlu1 %v635_v0  ;;  %517 = vset.pattern.permute.xlu0 %v635_v0  ;;  %v243_v2 = vld [vmem:[%s797_s0 + $0x8] sm:$0xff]  ;;  %v242_v4 = vld [vmem:[%s797_s0] sm:$0xff]  ;;  %v240_v5 = vld [vmem:[%s210_s7 + $0x10] sm:$0xff]  ;;  %s451_s22 = sshll.u32 %s623_s18, 3  ;;  %s235_s25 = scalar_lea.vmem [#allocation5], %s442_s21  ;;  %vm326_vm1 = vcmask 1043456  }
  0x24   : > { %267 = vperm.xlu1 %518, %v259_v1   ;;  %251 = vperm.xlu0 %517, %v243_v2   ;;  %v241_v6 = vld [vmem:[%s210_s7 + $0x18] sm:$0xff]  ;;  %v238_v15 = vld [vmem:[%s210_s7] sm:$0xff]  ;;  %v239_v16 = vld [vmem:[%s210_s7 + $0x8] sm:$0xff]  ;;  %s344_s7 = scalar_lea.hbm %s801_s4, %s451_s22  ;;  %s346_s5 = sshll.u32 %s235_s25, 4  ;;  %s347_s5 = int_to_ptr.vmem [resolvable:$true] %s346_s5 }
  0x25   : > { %v278_v25 = vld [vmem:[%s800_s3] sm:$0xf]  ;;  %s348_s8 = sshll.u32 %s344_s7, 4  ;;  %s331_s9 = scalar_lea.sflag [#allocation4], %s735_s24  ;;  %s349_s8 = int_to_ptr.hbm [resolvable:$true] %s348_s8 }
  0x26   : > { %s563_s10 = sshra.s32 %s349_s8, 4  ;;  %s569_s27 = scalar_lea.hbm %s801_s4, 16  ;;  %s564_s10 = int_to_ptr.hbm [resolvable:$true] %s563_s10 }
  0x27   : > { %s565_s18 = scalar_lea.hbm %s564_s10, 8  ;;  %p570_p7 = scmp.lt.s32.totalorder %s564_s10, %s801_s4 }
  0x28   : > { %p566_p4 = scmp.ne.s32.totalorder %s564_s10, %s565_s18  ;;  %p571_p8 = scmp.lt.s32.totalorder %s569_s27, %s565_s18 }
  0x2a   : > { %p567_p5 = pnand %p566_p4, %p712_p9  ;;  %p572_p10 = por %p571_p8, %p570_p7 }
  0x2c   : > { %262 = vperm.xlu1 %518, %v258_v3   ;;  %246 = vperm.xlu0 %517, %v242_v4   ;;  %p568_p6 = pneg %p567_p5 }
  0x2e   : > { %p573_p13 = pnand %p572_p10, %p568_p6 }
  0x96   : > { %v268_v7 = vpop.permute.xlu1 %267  ;;  %v252_v8 = vpop.permute.xlu0 %251 }
  0x97   : > { %v256_v9 = vmul.f32 %v252_v8, %v240_v5  ;;  %v257_v10 = vmul.f32 %v252_v8, %v241_v6 }
  0x99   : > { %v272_v11 = vadd.f32 %v268_v7, %v256_v9  ;;  %v273_v12 = vadd.f32 %v268_v7, %v257_v10 }
  0x9b   : > { %v276_v13 = vmax.f32 %v272_v11, 0.0  ;;  %v277_v14 = vmax.f32 %v273_v12, 0.0 }
  0x9d   : > { %297 = vmatpush.msra.mxu0 %v276_v13  ;;  %317 = vmatpush.msra.mxu1 %v277_v14 }
  0x9e   : > { %v247_v17 = vpop.permute.xlu0 %246  ;;  %v263_v20 = vpop.permute.xlu1 %262 }
  0x9f   : > { %v254_v18 = vmul.f32 %v247_v17, %v238_v15  ;;  %v255_v19 = vmul.f32 %v247_v17, %v239_v16 }
  0xa1   : > { %v270_v21 = vadd.f32 %v263_v20, %v254_v18  ;;  %v271_v22 = vadd.f32 %v263_v20, %v255_v19 }
  0xa3   : > { %v274_v23 = vmax.f32 %v270_v21, 0.0  ;;  %v275_v24 = vmax.f32 %v271_v22, 0.0 }
  0xa5   : > { %298 = vmatpush.msra.mxu0 %v274_v23  ;;  %318 = vmatpush.msra.mxu1 %v275_v24 }
  0xa6   : > { %444 = vmatmul.msk.f32.vlgmr.msra.gmra.mxu1 %vm279_vm0, %v278_v25  ;;  %443 = vmatmul.msk.f32.vlgmr.msra.gmra.mxu0 %vm279_vm0, %v278_v25 }
 0x123   : > { %v320_v26 = vpop.f32.mrf.mxu1  ;;  %v300_v27 = vpop.f32.mrf.mxu0 }
 0x124   : > { %v325_v28 = vrot.slane %v320_v26, 4 }
 0x126   : > { %v327_v29 = vsel %vm326_vm1, %v300_v27, %v325_v28 }
 0x127   : > { %329 = vst [vmem:[%s235_s25] sm:$0xff] %v327_v29 }
 0x128   : > { %576 = shalt.err (!%p573_p13)
}
 0x129   : > { %454 = dma.vmem_to_hbm [thread:$0]  (%p712_p9), %s347_s5, 128, %s349_s8, %s331_s9  }
 0x12a PF: > { %s360_s24 = sand.u32 1, %s611_s15   ;;  %p461_p0 = pnand %p436_p12, %p719_p11 }
 0x12b   : > { %s361_s21 = scalar_lea.sflag [#allocation4], %s360_s24 }
 0x12c   : > { %p462_p1 = pneg %p461_p0 }
 0x12e   : > { %606 = dma.done.wait (%p462_p1), %s361_s21, 128  }
 0x12f   : > { %608 = vsyncadd (%p462_p1), %s361_s21, 4294967168  ;;  %s20_s20 = sadd.s32 1, %s631_s20   ;;  %s806_s15 = smov %s615_s16 }
 0x130   : > { %p17_p2 = scmp.ge.s32.totalorder %s20_s20, 4   ;;  %s807_s16 = smov %s619_s17 }
 0x131   : > { %s808_s17 = smov %s717_s29  ;;  %s809_s18 = smov %s627_s19 }
 0x132   : > { %s810_s19 = smov %s812_s23  ;;  %19 = sbr.rel (!%p17_p2) target bundleno = 6 (0x6), region = 81 }
 0x137   :  { %367 = vsyncpa [#allocation3], 1 }
 0x138   :  { %369 = vsyncpa [#allocation3 + $0x1], 1 }
 0x139   :  { %370 = vsyncpa [#allocation4], 1 }
 0x13a   :  { %372 = vsyncpa [#allocation4 + $0x1], 1 }

</bundles_post_ra>
